<compile_context>
chip_gen: v6e
topology: v6e:2x2x1
jax: 0.10.0
libtpu: 0.0.40
codegen_flags: <defaults>
</compile_context>

<pallas_src>
import functools
import math

import jax
import jax.numpy as jnp
from jax import lax
from jax.experimental import pallas as pl
from jax.experimental.pallas import tpu as pltpu


def _layernorm(v, gamma, beta, eps=1e-5):
    """LayerNorm over the last axis, two-pass (centered) variance, f32."""
    mu = jnp.mean(v, axis=-1, keepdims=True)
    xc = v - mu
    var = jnp.mean(xc * xc, axis=-1, keepdims=True)
    return xc * lax.rsqrt(var + eps) * gamma + beta


def tfb_kernel(x_ref,
               wq_ref, wk_ref, wv_ref, bq_ref, bk_ref, bv_ref,
               wo_ref, bo_ref,
               g1_ref, be1_ref,
               w1_ref, bf1_ref, w2_ref, bf2_ref,
               g2_ref, be2_ref,
               out_ref, attn_ref, *, valid_s):
    bb, S, E = x_ref.shape

    # Fold the batch block into the matmul M dimension: (bb, S, E) -> (bb*S, E).
    # S % 8 == 0 is guaranteed by the wrapper, so this is a pure relayout.
    x = x_ref[...].reshape(bb * S, E)            # f32 (kept f32 for residuals)
    xb = x.astype(jnp.bfloat16)                  # bf16 MXU operand

    def dense(a_bf16, w_ref, b_ref):
        # bf16 x bf16 -> f32 accumulation on the MXU; bias added in f32.
        return jnp.dot(a_bf16, w_ref[...],
                       preferred_element_type=jnp.float32) + b_ref[...]

    # --- single-head attention projections (batch-folded rows) -------------
    q = dense(xb, wq_ref, bq_ref)                # (bb*S, E) f32
    k = dense(xb, wk_ref, bk_ref)
    v = dense(xb, wv_ref, bv_ref)

    qh = q.reshape(bb, S, E).astype(jnp.bfloat16)
    kh = k.reshape(bb, S, E).astype(jnp.bfloat16)
    vh = v.reshape(bb, S, E).astype(jnp.bfloat16)

    # scores = q @ k^T / sqrt(head_dim); num_heads=1 -> head_dim = E.
    # Batched dot_general contracting the last dims (no XLU transpose of k).
    scale = 1.0 / math.sqrt(E)
    scores = lax.dot_general(
        qh, kh,
        dimension_numbers=(((2,), (2,)), ((0,), (0,))),
        preferred_element_type=jnp.float32) * scale          # (bb, S, S) f32

    if valid_s != S:  # static check: mask padded key columns
        key_mask = lax.broadcasted_iota(jnp.int32, (1, 1, S), 2) < valid_s
        scores = jnp.where(key_mask, scores, -1e30)

    # Numerically-stable softmax in f32; exact normalization (attn_weights is
    # a returned API output, so no approximate reciprocal here).
    m = jnp.max(scores, axis=-1, keepdims=True)
    p = jnp.exp(scores - m)
    attn = p / jnp.sum(p, axis=-1, keepdims=True)

    ctx = lax.dot_general(
        attn.astype(jnp.bfloat16), vh,
        dimension_numbers=(((2,), (1,)), ((0,), (0,))),
        preferred_element_type=jnp.float32)                   # (bb, S, E) f32
    ctx_b = ctx.reshape(bb * S, E).astype(jnp.bfloat16)       # bf16 live range

    attn_out = dense(ctx_b, wo_ref, bo_ref)                   # out_proj

    # --- residual + LayerNorm1 ----------------------------------------------
    y = _layernorm(x + attn_out, g1_ref[...], be1_ref[...])

    # --- feed-forward: Linear -> ReLU -> Linear (dropout = identity, eval) ---
    h = jnp.maximum(dense(y.astype(jnp.bfloat16), w1_ref, bf1_ref),
                    0.0).astype(jnp.bfloat16)                 # bf16 hidden only
    ff = dense(h, w2_ref, bf2_ref)

    # --- residual + LayerNorm2 ----------------------------------------------
    z = _layernorm(y + ff, g2_ref[...], be2_ref[...])

    out_ref[...] = z.reshape(bb, S, E)
    attn_ref[...] = attn


def _hw_budget():
    """(target_rows, vmem_limit_bytes) scaled to the chip generation."""
    vmem_cap = None
    try:
        info = pltpu.get_tpu_info()
        vmem_cap = (getattr(info, "vmem_capacity_bytes", None)
                    or getattr(info, "vmem_size_bytes", None))
    except Exception:
        vmem_cap = None
    if vmem_cap is None:
        return 512, 32 * 1024 * 1024            # conservative: fits everywhere
    if vmem_cap <= 80 * 1024 * 1024:            # v7x: 64 MiB per TensorCore
        return 512, 48 * 1024 * 1024
    return 1024, 96 * 1024 * 1024               # v5e / v6e: 128 MiB physical


def _pick_batch_block(B, S, target_rows):
    """Batch block size: bb*S <= target_rows, >=2 grid steps when B>=2, and
    bb*S a multiple of 256 (full MXU passes) when possible, else 128, else 8."""
    bb_max = max(1, target_rows // max(S, 1))
    bb_max = min(bb_max, B)
    if B >= 2:
        bb_max = min(bb_max, -(-B // 2))        # >= 2 grid steps (v7x megacore)
    bb_max = max(bb_max, 1)
    for align in (256, 128, 8):
        for bb in range(bb_max, 0, -1):
            if (bb * S) % align == 0:
                return bb
    return bb_max


def prepare_params(params):
    """Hoist the bf16 weight casts out of the forward path (call once)."""
    out = dict(params)
    for name in ("wq", "wk", "wv", "wo", "w1", "w2"):
        out[name] = params[name].astype(jnp.bfloat16)
    return out


def transformer_feature_block(x, params):
    """x: (B, S, E) float32.  Returns (out (B,S,E), attn_weights (B,S,S)).

    Pass params through prepare_params() once so weights are already bf16;
    otherwise they are cast here (correct, but costs a per-call HBM copy)."""
    B, S, E = x.shape
    H = params["w1"].shape[1]

    target_rows, vmem_limit = _hw_budget()

    # Pad S to a multiple of 8 so the in-kernel reshape is a pure relayout;
    # padded key columns are masked in the softmax.
    S_pad = -(-S // 8) * 8
    bb = _pick_batch_block(B, S_pad, target_rows)
    B_pad = -(-B // bb) * bb
    padded = (S_pad != S) or (B_pad != B)
    if padded:
        x = jnp.pad(x, ((0, B_pad - B), (0, S_pad - S), (0, 0)))
    grid = (B_pad // bb,)

    bf16 = jnp.bfloat16
    getw = lambda n: (params[n] if params[n].dtype == bf16
                      else params[n].astype(bf16))
    wq, wk, wv, wo, w1, w2 = (getw(n) for n in ("wq", "wk", "wv", "wo", "w1", "w2"))

    def const(shape):
        # Constant index_map + single buffer: DMA'd once, one VMEM copy.
        imap = lambda g: (0,) * len(shape)
        if hasattr(pl, "Buffered"):
            try:
                return pl.BlockSpec(shape, imap, pipeline_mode=pl.Buffered(1))
            except TypeError:
                pass
        return pl.BlockSpec(shape, imap)

    in_specs = [
        pl.BlockSpec((bb, S_pad, E), lambda g: (g, 0, 0)),   # x
        const((E, E)), const((E, E)), const((E, E)),         # wq wk wv
        const((1, E)), const((1, E)), const((1, E)),         # bq bk bv
        const((E, E)), const((1, E)),                        # wo bo
        const((1, E)), const((1, E)),                        # ln1 gamma/beta
        const((E, H)), const((1, H)),                        # ff w1 b1
        const((H, E)), const((1, E)),                        # ff w2 b2
        const((1, E)), const((1, E)),                        # ln2 gamma/beta
    ]
    out_specs = [
        pl.BlockSpec((bb, S_pad, E), lambda g: (g, 0, 0)),
        pl.BlockSpec((bb, S_pad, S_pad), lambda g: (g, 0, 0)),
    ]
    out_shape = (
        jax.ShapeDtypeStruct((B_pad, S_pad, E), jnp.float32),
        jax.ShapeDtypeStruct((B_pad, S_pad, S_pad), jnp.float32),
    )

    # Advisory cost estimate for XLA's scheduler.
    flops = int(2 * B_pad * S_pad * (4 * E * E + 2 * S_pad * E + 2 * E * H)
                + 16 * B_pad * S_pad * E)
    transcendentals = int(B_pad * S_pad * S_pad + 2 * B_pad * S_pad)
    bytes_accessed = int(
        B_pad * S_pad * E * 4                    # x (f32)
        + (4 * E * E + 2 * E * H) * 2            # bf16 weights (single DMA)
        + (9 * E + H) * 4                        # biases + LN params (f32)
        + B_pad * S_pad * E * 4                  # out (f32)
        + B_pad * S_pad * S_pad * 4)             # attn (f32)

    fn = pl.pallas_call(
        functools.partial(tfb_kernel, valid_s=S),
        out_shape=out_shape,
        grid_spec=pltpu.PrefetchScalarGridSpec(
            num_scalar_prefetch=0,
            grid=grid,
            in_specs=in_specs,
            out_specs=out_specs,
        ),
        compiler_params=pltpu.CompilerParams(
            dimension_semantics=("parallel",),
            vmem_limit_bytes=vmem_limit,
        ),
        cost_estimate=pl.CostEstimate(
            flops=flops,
            transcendentals=transcendentals,
            bytes_accessed=bytes_accessed),
    )

    out, attn = fn(
        x,
        wq, wk, wv,
        params["bq"], params["bk"], params["bv"],
        wo, params["bo"],
        params["g1"], params["be1"],
        w1, params["bf1"], w2, params["bf2"],
        params["g2"], params["be2"],
    )
    if padded:
        out = out[:B, :S, :]
        attn = attn[:B, :S, :S]
    return out, attn


def reference_forward(x, p, matmul_dtype=jnp.float32):
    """Pure-JAX reference of the PyTorch forward (eval mode).

    matmul_dtype controls the MXU operand precision so the same function serves
    both as the exact-f32 spec and as a bf16-operand reference matching the
    kernel's matmul precision (accumulation is always f32)."""
    E = x.shape[-1]
    md = matmul_dtype
    f32 = jnp.float32
    mm = lambda a, b: jnp.matmul(a.astype(md), b.astype(md),
                                 preferred_element_type=f32)
    q = mm(x, p["wq"]) + p["bq"]
    k = mm(x, p["wk"]) + p["bk"]
    v = mm(x, p["wv"]) + p["bv"]
    scores = jnp.einsum("bqe,bke->bqk", q.astype(md), k.astype(md),
                        preferred_element_type=f32) / math.sqrt(E)
    attn = jax.nn.softmax(scores, axis=-1)
    ctx = jnp.einsum("bqk,bke->bqe", attn.astype(md), v.astype(md),
                     preferred_element_type=f32)
    attn_out = mm(ctx, p["wo"]) + p["bo"]
    y = _layernorm(x + attn_out, p["g1"], p["be1"])
    ff = mm(jnp.maximum(mm(y, p["w1"]) + p["bf1"], 0.0), p["w2"]) + p["bf2"]
    z = _layernorm(y + ff, p["g2"], p["be2"])
    return z, attn


def init_params(key, embed_dim, ff_expansion=4):
    E = embed_dim
    H = E * ff_expansion
    ks = jax.random.split(key, 8)
    s = 0.1
    return {
        "wq": s * jax.random.normal(ks[0], (E, E), jnp.float32),
        "wk": s * jax.random.normal(ks[1], (E, E), jnp.float32),
        "wv": s * jax.random.normal(ks[2], (E, E), jnp.float32),
        "bq": s * jax.random.normal(ks[3], (1, E), jnp.float32),
        "bk": jnp.zeros((1, E), jnp.float32),
        "bv": jnp.zeros((1, E), jnp.float32),
        "wo": s * jax.random.normal(ks[4], (E, E), jnp.float32),
        "bo": jnp.zeros((1, E), jnp.float32),
        "g1": jnp.ones((1, E), jnp.float32),
        "be1": jnp.zeros((1, E), jnp.float32),
        "w1": s * jax.random.normal(ks[5], (E, H), jnp.float32),
        "bf1": s * jax.random.normal(ks[6], (1, H), jnp.float32),
        "w2": s * jax.random.normal(ks[7], (H, E), jnp.float32),
        "bf2": jnp.zeros((1, E), jnp.float32),
        "g2": jnp.ones((1, E), jnp.float32),
        "be2": jnp.zeros((1, E), jnp.float32),
    }


if __name__ == "__main__":
    B, S, E = 2, 8, 32
    key = jax.random.PRNGKey(0)
    k_x, k_p = jax.random.split(key)
    x = jax.random.normal(k_x, (B, S, E), jnp.float32)
    params = init_params(k_p, E)
    dev_params = prepare_params(params)      # bf16 weights cast once, up front

    tfb = jax.jit(transformer_feature_block)
    out, attn = tfb(x, dev_params)
    out = jax.block_until_ready(out)
    attn = jax.block_until_ready(attn)

    # Reference with the same (bf16-operand, f32-accumulate) matmul precision.
    ref_out_bf, ref_attn_bf = reference_forward(x, params, matmul_dtype=jnp.bfloat16)
    # Full-f32 reference (original PyTorch-module semantics).
    ref_out_f32, ref_attn_f32 = reference_forward(x, params, matmul_dtype=jnp.float32)

    assert out.shape == (B, S, E) and attn.shape == (B, S, S)
    assert jnp.allclose(attn.sum(-1), 1.0, atol=1e-3), \
        float(jnp.max(jnp.abs(attn.sum(-1) - 1.0)))
    assert jnp.allclose(attn, ref_attn_bf, atol=1e-2), \
        float(jnp.max(jnp.abs(attn - ref_attn_bf)))
    assert jnp.allclose(out, ref_out_bf, atol=1e-2, rtol=1e-2), \
        float(jnp.max(jnp.abs(out - ref_out_bf)))
    assert jnp.allclose(out, ref_out_f32, atol=5e-2, rtol=5e-2), \
        float(jnp.max(jnp.abs(out - ref_out_f32)))

    print("KERNEL_OK")
</pallas_src>

<mosaic_0001>
module attributes {stable_mosaic.version = 11 : i64} {
  func.func @tfb_kernel(%arg0: i32, %arg1: memref<1x8x32xf32, #tpu.memory_space<vmem>>, %arg2: memref<32x32xbf16, #tpu.memory_space<vmem>>, %arg3: memref<32x32xbf16, #tpu.memory_space<vmem>>, %arg4: memref<32x32xbf16, #tpu.memory_space<vmem>>, %arg5: memref<1x32xf32, #tpu.memory_space<vmem>>, %arg6: memref<1x32xf32, #tpu.memory_space<vmem>>, %arg7: memref<1x32xf32, #tpu.memory_space<vmem>>, %arg8: memref<32x32xbf16, #tpu.memory_space<vmem>>, %arg9: memref<1x32xf32, #tpu.memory_space<vmem>>, %arg10: memref<1x32xf32, #tpu.memory_space<vmem>>, %arg11: memref<1x32xf32, #tpu.memory_space<vmem>>, %arg12: memref<32x128xbf16, #tpu.memory_space<vmem>>, %arg13: memref<1x128xf32, #tpu.memory_space<vmem>>, %arg14: memref<128x32xbf16, #tpu.memory_space<vmem>>, %arg15: memref<1x32xf32, #tpu.memory_space<vmem>>, %arg16: memref<1x32xf32, #tpu.memory_space<vmem>>, %arg17: memref<1x32xf32, #tpu.memory_space<vmem>>, %arg18: memref<1x8x32xf32, #tpu.memory_space<vmem>>, %arg19: memref<1x8x8xf32, #tpu.memory_space<vmem>>) attributes {dimension_semantics = [#tpu.dimension_semantics<parallel>], iteration_bounds = array<i64: 2>, scalar_prefetch = 0 : i64, scratch_operands = 0 : i64, tpu.core_type = #tpu.core_type<tc>, window_params = [{transform_indices = @transform_0, window_bounds = array<i64: 1, 8, 32>}, {pipeline_mode = #tpu.pipeline_mode<synchronous>, transform_indices = @transform_1, window_bounds = array<i64: 32, 32>}, {pipeline_mode = #tpu.pipeline_mode<synchronous>, transform_indices = @transform_2, window_bounds = array<i64: 32, 32>}, {pipeline_mode = #tpu.pipeline_mode<synchronous>, transform_indices = @transform_3, window_bounds = array<i64: 32, 32>}, {pipeline_mode = #tpu.pipeline_mode<synchronous>, transform_indices = @transform_4, window_bounds = array<i64: 1, 32>}, {pipeline_mode = #tpu.pipeline_mode<synchronous>, transform_indices = @transform_5, window_bounds = array<i64: 1, 32>}, {pipeline_mode = #tpu.pipeline_mode<synchronous>, transform_indices = @transform_6, window_bounds = array<i64: 1, 32>}, {pipeline_mode = #tpu.pipeline_mode<synchronous>, transform_indices = @transform_7, window_bounds = array<i64: 32, 32>}, {pipeline_mode = #tpu.pipeline_mode<synchronous>, transform_indices = @transform_8, window_bounds = array<i64: 1, 32>}, {pipeline_mode = #tpu.pipeline_mode<synchronous>, transform_indices = @transform_9, window_bounds = array<i64: 1, 32>}, {pipeline_mode = #tpu.pipeline_mode<synchronous>, transform_indices = @transform_10, window_bounds = array<i64: 1, 32>}, {pipeline_mode = #tpu.pipeline_mode<synchronous>, transform_indices = @transform_11, window_bounds = array<i64: 32, 128>}, {pipeline_mode = #tpu.pipeline_mode<synchronous>, transform_indices = @transform_12, window_bounds = array<i64: 1, 128>}, {pipeline_mode = #tpu.pipeline_mode<synchronous>, transform_indices = @transform_13, window_bounds = array<i64: 128, 32>}, {pipeline_mode = #tpu.pipeline_mode<synchronous>, transform_indices = @transform_14, window_bounds = array<i64: 1, 32>}, {pipeline_mode = #tpu.pipeline_mode<synchronous>, transform_indices = @transform_15, window_bounds = array<i64: 1, 32>}, {pipeline_mode = #tpu.pipeline_mode<synchronous>, transform_indices = @transform_16, window_bounds = array<i64: 1, 32>}, {transform_indices = @transform_17, window_bounds = array<i64: 1, 8, 32>}, {transform_indices = @transform_18, window_bounds = array<i64: 1, 8, 8>}]} {
    %c0 = arith.constant 0 : index
    %c0_0 = arith.constant 0 : index
    %c0_1 = arith.constant 0 : index
    %0 = vector.load %arg1[%c0, %c0_0, %c0_1] : memref<1x8x32xf32, #tpu.memory_space<vmem>>, vector<1x8x32xf32>
    %1 = vector.shape_cast %0 : vector<1x8x32xf32> to vector<8x32xf32>
    %2 = arith.truncf %1 : vector<8x32xf32> to vector<8x32xbf16>
    %c0_2 = arith.constant 0 : index
    %c0_3 = arith.constant 0 : index
    %3 = vector.load %arg2[%c0_2, %c0_3] : memref<32x32xbf16, #tpu.memory_space<vmem>>, vector<32x32xbf16>
    %cst = arith.constant dense<0.000000e+00> : vector<8x32xf32>
    %4 = tpu.matmul %2, %3, %cst {dimension_numbers = #tpu.dot_dimension_numbers<[1], [0], [0], [1], [0, 0, 1, 1], [], []>} : vector<8x32xbf16>, vector<32x32xbf16>, vector<8x32xf32> -> vector<8x32xf32>
    %c0_4 = arith.constant 0 : index
    %c0_5 = arith.constant 0 : index
    %5 = vector.load %arg5[%c0_4, %c0_5] : memref<1x32xf32, #tpu.memory_space<vmem>>, vector<1x32xf32>
    %6 = vector.broadcast %5 : vector<1x32xf32> to vector<8x32xf32>
    %7 = arith.addf %4, %6 : vector<8x32xf32>
    %c0_6 = arith.constant 0 : index
    %c0_7 = arith.constant 0 : index
    %8 = vector.load %arg3[%c0_6, %c0_7] : memref<32x32xbf16, #tpu.memory_space<vmem>>, vector<32x32xbf16>
    %cst_8 = arith.constant dense<0.000000e+00> : vector<8x32xf32>
    %9 = tpu.matmul %2, %8, %cst_8 {dimension_numbers = #tpu.dot_dimension_numbers<[1], [0], [0], [1], [0, 0, 1, 1], [], []>} : vector<8x32xbf16>, vector<32x32xbf16>, vector<8x32xf32> -> vector<8x32xf32>
    %c0_9 = arith.constant 0 : index
    %c0_10 = arith.constant 0 : index
    %10 = vector.load %arg6[%c0_9, %c0_10] : memref<1x32xf32, #tpu.memory_space<vmem>>, vector<1x32xf32>
    %11 = vector.broadcast %10 : vector<1x32xf32> to vector<8x32xf32>
    %12 = arith.addf %9, %11 : vector<8x32xf32>
    %c0_11 = arith.constant 0 : index
    %c0_12 = arith.constant 0 : index
    %13 = vector.load %arg4[%c0_11, %c0_12] : memref<32x32xbf16, #tpu.memory_space<vmem>>, vector<32x32xbf16>
    %cst_13 = arith.constant dense<0.000000e+00> : vector<8x32xf32>
    %14 = tpu.matmul %2, %13, %cst_13 {dimension_numbers = #tpu.dot_dimension_numbers<[1], [0], [0], [1], [0, 0, 1, 1], [], []>} : vector<8x32xbf16>, vector<32x32xbf16>, vector<8x32xf32> -> vector<8x32xf32>
    %c0_14 = arith.constant 0 : index
    %c0_15 = arith.constant 0 : index
    %15 = vector.load %arg7[%c0_14, %c0_15] : memref<1x32xf32, #tpu.memory_space<vmem>>, vector<1x32xf32>
    %16 = vector.broadcast %15 : vector<1x32xf32> to vector<8x32xf32>
    %17 = arith.addf %14, %16 : vector<8x32xf32>
    %18 = vector.shape_cast %7 : vector<8x32xf32> to vector<1x8x32xf32>
    %19 = arith.truncf %18 : vector<1x8x32xf32> to vector<1x8x32xbf16>
    %20 = vector.shape_cast %12 : vector<8x32xf32> to vector<1x8x32xf32>
    %21 = arith.truncf %20 : vector<1x8x32xf32> to vector<1x8x32xbf16>
    %22 = vector.shape_cast %17 : vector<8x32xf32> to vector<1x8x32xf32>
    %23 = arith.truncf %22 : vector<1x8x32xf32> to vector<1x8x32xbf16>
    %cst_16 = arith.constant dense<0.000000e+00> : vector<1x8x8xf32>
    %24 = tpu.matmul %19, %21, %cst_16 {dimension_numbers = #tpu.dot_dimension_numbers<[2], [2], [1], [1], [0, 0, 0, 1, 1, 1], [0], [0]>} : vector<1x8x32xbf16>, vector<1x8x32xbf16>, vector<1x8x8xf32> -> vector<1x8x8xf32>
    %cst_17 = arith.constant 0.176776692 : f32
    %25 = vector.broadcast %cst_17 : f32 to vector<1x8x8xf32>
    %26 = arith.mulf %24, %25 : vector<1x8x8xf32>
    %cst_18 = arith.constant dense<0xFF800000> : vector<1x8xf32>
    %27 = vector.multi_reduction <maximumf>, %26, %cst_18 [2] : vector<1x8x8xf32> to vector<1x8xf32>
    %28 = vector.shape_cast %27 : vector<1x8xf32> to vector<1x8x1xf32>
    %29 = vector.broadcast %28 : vector<1x8x1xf32> to vector<1x8x8xf32>
    %30 = arith.subf %26, %29 : vector<1x8x8xf32>
    %31 = math.exp %30 : vector<1x8x8xf32>
    %cst_19 = arith.constant dense<0.000000e+00> : vector<1x8xf32>
    %32 = vector.multi_reduction <add>, %31, %cst_19 [2] : vector<1x8x8xf32> to vector<1x8xf32>
    %33 = vector.shape_cast %32 : vector<1x8xf32> to vector<1x8x1xf32>
    %34 = vector.broadcast %33 : vector<1x8x1xf32> to vector<1x8x8xf32>
    %35 = arith.divf %31, %34 : vector<1x8x8xf32>
    %36 = arith.truncf %35 : vector<1x8x8xf32> to vector<1x8x8xbf16>
    %cst_20 = arith.constant dense<0.000000e+00> : vector<1x8x32xf32>
    %37 = tpu.matmul %36, %23, %cst_20 {dimension_numbers = #tpu.dot_dimension_numbers<[2], [1], [1], [2], [0, 0, 0, 1, 1, 2], [0], [0]>} : vector<1x8x8xbf16>, vector<1x8x32xbf16>, vector<1x8x32xf32> -> vector<1x8x32xf32>
    %38 = vector.shape_cast %37 : vector<1x8x32xf32> to vector<8x32xf32>
    %39 = arith.truncf %38 : vector<8x32xf32> to vector<8x32xbf16>
    %c0_21 = arith.constant 0 : index
    %c0_22 = arith.constant 0 : index
    %40 = vector.load %arg8[%c0_21, %c0_22] : memref<32x32xbf16, #tpu.memory_space<vmem>>, vector<32x32xbf16>
    %cst_23 = arith.constant dense<0.000000e+00> : vector<8x32xf32>
    %41 = tpu.matmul %39, %40, %cst_23 {dimension_numbers = #tpu.dot_dimension_numbers<[1], [0], [0], [1], [0, 0, 1, 1], [], []>} : vector<8x32xbf16>, vector<32x32xbf16>, vector<8x32xf32> -> vector<8x32xf32>
    %c0_24 = arith.constant 0 : index
    %c0_25 = arith.constant 0 : index
    %42 = vector.load %arg9[%c0_24, %c0_25] : memref<1x32xf32, #tpu.memory_space<vmem>>, vector<1x32xf32>
    %43 = vector.broadcast %42 : vector<1x32xf32> to vector<8x32xf32>
    %44 = arith.addf %41, %43 : vector<8x32xf32>
    %45 = arith.addf %1, %44 : vector<8x32xf32>
    %c0_26 = arith.constant 0 : index
    %c0_27 = arith.constant 0 : index
    %46 = vector.load %arg10[%c0_26, %c0_27] : memref<1x32xf32, #tpu.memory_space<vmem>>, vector<1x32xf32>
    %c0_28 = arith.constant 0 : index
    %c0_29 = arith.constant 0 : index
    %47 = vector.load %arg11[%c0_28, %c0_29] : memref<1x32xf32, #tpu.memory_space<vmem>>, vector<1x32xf32>
    %cst_30 = arith.constant dense<0.000000e+00> : vector<8xf32>
    %48 = vector.multi_reduction <add>, %45, %cst_30 [1] : vector<8x32xf32> to vector<8xf32>
    %49 = vector.shape_cast %48 : vector<8xf32> to vector<8x1xf32>
    %cst_31 = arith.constant 3.200000e+01 : f32
    %50 = vector.broadcast %cst_31 : f32 to vector<8x1xf32>
    %51 = arith.divf %49, %50 : vector<8x1xf32>
    %52 = vector.broadcast %51 : vector<8x1xf32> to vector<8x32xf32>
    %53 = arith.subf %45, %52 : vector<8x32xf32>
    %54 = arith.mulf %53, %53 : vector<8x32xf32>
    %cst_32 = arith.constant dense<0.000000e+00> : vector<8xf32>
    %55 = vector.multi_reduction <add>, %54, %cst_32 [1] : vector<8x32xf32> to vector<8xf32>
    %56 = vector.shape_cast %55 : vector<8xf32> to vector<8x1xf32>
    %cst_33 = arith.constant 3.200000e+01 : f32
    %57 = vector.broadcast %cst_33 : f32 to vector<8x1xf32>
    %58 = arith.divf %56, %57 : vector<8x1xf32>
    %cst_34 = arith.constant 9.99999974E-6 : f32
    %59 = vector.broadcast %cst_34 : f32 to vector<8x1xf32>
    %60 = arith.addf %58, %59 : vector<8x1xf32>
    %61 = math.rsqrt %60 : vector<8x1xf32>
    %62 = vector.broadcast %61 : vector<8x1xf32> to vector<8x32xf32>
    %63 = arith.mulf %53, %62 : vector<8x32xf32>
    %64 = vector.broadcast %46 : vector<1x32xf32> to vector<8x32xf32>
    %65 = arith.mulf %63, %64 : vector<8x32xf32>
    %66 = vector.broadcast %47 : vector<1x32xf32> to vector<8x32xf32>
    %67 = arith.addf %65, %66 : vector<8x32xf32>
    %68 = arith.truncf %67 : vector<8x32xf32> to vector<8x32xbf16>
    %c0_35 = arith.constant 0 : index
    %c0_36 = arith.constant 0 : index
    %69 = vector.load %arg12[%c0_35, %c0_36] : memref<32x128xbf16, #tpu.memory_space<vmem>>, vector<32x128xbf16>
    %cst_37 = arith.constant dense<0.000000e+00> : vector<8x128xf32>
    %70 = tpu.matmul %68, %69, %cst_37 {dimension_numbers = #tpu.dot_dimension_numbers<[1], [0], [0], [1], [0, 0, 1, 1], [], []>} : vector<8x32xbf16>, vector<32x128xbf16>, vector<8x128xf32> -> vector<8x128xf32>
    %c0_38 = arith.constant 0 : index
    %c0_39 = arith.constant 0 : index
    %71 = vector.load %arg13[%c0_38, %c0_39] : memref<1x128xf32, #tpu.memory_space<vmem>>, vector<1x128xf32>
    %72 = vector.broadcast %71 : vector<1x128xf32> to vector<8x128xf32>
    %73 = arith.addf %70, %72 : vector<8x128xf32>
    %cst_40 = arith.constant 0.000000e+00 : f32
    %74 = vector.broadcast %cst_40 : f32 to vector<8x128xf32>
    %75 = arith.maximumf %73, %74 : vector<8x128xf32>
    %76 = arith.truncf %75 : vector<8x128xf32> to vector<8x128xbf16>
    %c0_41 = arith.constant 0 : index
    %c0_42 = arith.constant 0 : index
    %77 = vector.load %arg14[%c0_41, %c0_42] : memref<128x32xbf16, #tpu.memory_space<vmem>>, vector<128x32xbf16>
    %cst_43 = arith.constant dense<0.000000e+00> : vector<8x32xf32>
    %78 = tpu.matmul %76, %77, %cst_43 {dimension_numbers = #tpu.dot_dimension_numbers<[1], [0], [0], [1], [0, 0, 1, 1], [], []>} : vector<8x128xbf16>, vector<128x32xbf16>, vector<8x32xf32> -> vector<8x32xf32>
    %c0_44 = arith.constant 0 : index
    %c0_45 = arith.constant 0 : index
    %79 = vector.load %arg15[%c0_44, %c0_45] : memref<1x32xf32, #tpu.memory_space<vmem>>, vector<1x32xf32>
    %80 = vector.broadcast %79 : vector<1x32xf32> to vector<8x32xf32>
    %81 = arith.addf %78, %80 : vector<8x32xf32>
    %82 = arith.addf %67, %81 : vector<8x32xf32>
    %c0_46 = arith.constant 0 : index
    %c0_47 = arith.constant 0 : index
    %83 = vector.load %arg16[%c0_46, %c0_47] : memref<1x32xf32, #tpu.memory_space<vmem>>, vector<1x32xf32>
    %c0_48 = arith.constant 0 : index
    %c0_49 = arith.constant 0 : index
    %84 = vector.load %arg17[%c0_48, %c0_49] : memref<1x32xf32, #tpu.memory_space<vmem>>, vector<1x32xf32>
    %cst_50 = arith.constant dense<0.000000e+00> : vector<8xf32>
    %85 = vector.multi_reduction <add>, %82, %cst_50 [1] : vector<8x32xf32> to vector<8xf32>
    %86 = vector.shape_cast %85 : vector<8xf32> to vector<8x1xf32>
    %cst_51 = arith.constant 3.200000e+01 : f32
    %87 = vector.broadcast %cst_51 : f32 to vector<8x1xf32>
    %88 = arith.divf %86, %87 : vector<8x1xf32>
    %89 = vector.broadcast %88 : vector<8x1xf32> to vector<8x32xf32>
    %90 = arith.subf %82, %89 : vector<8x32xf32>
    %91 = arith.mulf %90, %90 : vector<8x32xf32>
    %cst_52 = arith.constant dense<0.000000e+00> : vector<8xf32>
    %92 = vector.multi_reduction <add>, %91, %cst_52 [1] : vector<8x32xf32> to vector<8xf32>
    %93 = vector.shape_cast %92 : vector<8xf32> to vector<8x1xf32>
    %cst_53 = arith.constant 3.200000e+01 : f32
    %94 = vector.broadcast %cst_53 : f32 to vector<8x1xf32>
    %95 = arith.divf %93, %94 : vector<8x1xf32>
    %cst_54 = arith.constant 9.99999974E-6 : f32
    %96 = vector.broadcast %cst_54 : f32 to vector<8x1xf32>
    %97 = arith.addf %95, %96 : vector<8x1xf32>
    %98 = math.rsqrt %97 : vector<8x1xf32>
    %99 = vector.broadcast %98 : vector<8x1xf32> to vector<8x32xf32>
    %100 = arith.mulf %90, %99 : vector<8x32xf32>
    %101 = vector.broadcast %83 : vector<1x32xf32> to vector<8x32xf32>
    %102 = arith.mulf %100, %101 : vector<8x32xf32>
    %103 = vector.broadcast %84 : vector<1x32xf32> to vector<8x32xf32>
    %104 = arith.addf %102, %103 : vector<8x32xf32>
    %105 = vector.shape_cast %104 : vector<8x32xf32> to vector<1x8x32xf32>
    %c0_55 = arith.constant 0 : index
    %c0_56 = arith.constant 0 : index
    %c0_57 = arith.constant 0 : index
    %106 = vector.load %arg18[%c0_55, %c0_56, %c0_57] : memref<1x8x32xf32, #tpu.memory_space<vmem>>, vector<1x8x32xf32>
    tpu.vector_store %arg18[%c0_55, %c0_56, %c0_57], %105 {strides = array<i32>} : memref<1x8x32xf32, #tpu.memory_space<vmem>>, vector<1x8x32xf32>,
    %c0_58 = arith.constant 0 : index
    %c0_59 = arith.constant 0 : index
    %c0_60 = arith.constant 0 : index
    %107 = vector.load %arg19[%c0_58, %c0_59, %c0_60] : memref<1x8x8xf32, #tpu.memory_space<vmem>>, vector<1x8x8xf32>
    tpu.vector_store %arg19[%c0_58, %c0_59, %c0_60], %35 {strides = array<i32>} : memref<1x8x8xf32, #tpu.memory_space<vmem>>, vector<1x8x8xf32>,
    return
  }
  func.func @transform_0(%arg0: i32) -> (i32, i32, i32) {
    %c0_i32 = arith.constant 0 : i32
    %c0_i32_0 = arith.constant 0 : i32
    %c0_i32_1 = arith.constant 0 : i32
    return %arg0, %c0_i32, %c0_i32_0 : i32, i32, i32
  }
  func.func @transform_1(%arg0: i32) -> (i32, i32) {
    %c0_i32 = arith.constant 0 : i32
    %c0_i32_0 = arith.constant 0 : i32
    %c0_i32_1 = arith.constant 0 : i32
    return %c0_i32, %c0_i32_0 : i32, i32
  }
  func.func @transform_2(%arg0: i32) -> (i32, i32) {
    %c0_i32 = arith.constant 0 : i32
    %c0_i32_0 = arith.constant 0 : i32
    %c0_i32_1 = arith.constant 0 : i32
    return %c0_i32, %c0_i32_0 : i32, i32
  }
  func.func @transform_3(%arg0: i32) -> (i32, i32) {
    %c0_i32 = arith.constant 0 : i32
    %c0_i32_0 = arith.constant 0 : i32
    %c0_i32_1 = arith.constant 0 : i32
    return %c0_i32, %c0_i32_0 : i32, i32
  }
  func.func @transform_4(%arg0: i32) -> (i32, i32) {
    %c0_i32 = arith.constant 0 : i32
    %c0_i32_0 = arith.constant 0 : i32
    %c0_i32_1 = arith.constant 0 : i32
    return %c0_i32, %c0_i32_0 : i32, i32
  }
  func.func @transform_5(%arg0: i32) -> (i32, i32) {
    %c0_i32 = arith.constant 0 : i32
    %c0_i32_0 = arith.constant 0 : i32
    %c0_i32_1 = arith.constant 0 : i32
    return %c0_i32, %c0_i32_0 : i32, i32
  }
  func.func @transform_6(%arg0: i32) -> (i32, i32) {
    %c0_i32 = arith.constant 0 : i32
    %c0_i32_0 = arith.constant 0 : i32
    %c0_i32_1 = arith.constant 0 : i32
    return %c0_i32, %c0_i32_0 : i32, i32
  }
  func.func @transform_7(%arg0: i32) -> (i32, i32) {
    %c0_i32 = arith.constant 0 : i32
    %c0_i32_0 = arith.constant 0 : i32
    %c0_i32_1 = arith.constant 0 : i32
    return %c0_i32, %c0_i32_0 : i32, i32
  }
  func.func @transform_8(%arg0: i32) -> (i32, i32) {
    %c0_i32 = arith.constant 0 : i32
    %c0_i32_0 = arith.constant 0 : i32
    %c0_i32_1 = arith.constant 0 : i32
    return %c0_i32, %c0_i32_0 : i32, i32
  }
  func.func @transform_9(%arg0: i32) -> (i32, i32) {
    %c0_i32 = arith.constant 0 : i32
    %c0_i32_0 = arith.constant 0 : i32
    %c0_i32_1 = arith.constant 0 : i32
    return %c0_i32, %c0_i32_0 : i32, i32
  }
  func.func @transform_10(%arg0: i32) -> (i32, i32) {
    %c0_i32 = arith.constant 0 : i32
    %c0_i32_0 = arith.constant 0 : i32
    %c0_i32_1 = arith.constant 0 : i32
    return %c0_i32, %c0_i32_0 : i32, i32
  }
  func.func @transform_11(%arg0: i32) -> (i32, i32) {
    %c0_i32 = arith.constant 0 : i32
    %c0_i32_0 = arith.constant 0 : i32
    %c0_i32_1 = arith.constant 0 : i32
    return %c0_i32, %c0_i32_0 : i32, i32
  }
  func.func @transform_12(%arg0: i32) -> (i32, i32) {
    %c0_i32 = arith.constant 0 : i32
    %c0_i32_0 = arith.constant 0 : i32
    %c0_i32_1 = arith.constant 0 : i32
    return %c0_i32, %c0_i32_0 : i32, i32
  }
  func.func @transform_13(%arg0: i32) -> (i32, i32) {
    %c0_i32 = arith.constant 0 : i32
    %c0_i32_0 = arith.constant 0 : i32
    %c0_i32_1 = arith.constant 0 : i32
    return %c0_i32, %c0_i32_0 : i32, i32
  }
  func.func @transform_14(%arg0: i32) -> (i32, i32) {
    %c0_i32 = arith.constant 0 : i32
    %c0_i32_0 = arith.constant 0 : i32
    %c0_i32_1 = arith.constant 0 : i32
    return %c0_i32, %c0_i32_0 : i32, i32
  }
  func.func @transform_15(%arg0: i32) -> (i32, i32) {
    %c0_i32 = arith.constant 0 : i32
    %c0_i32_0 = arith.constant 0 : i32
    %c0_i32_1 = arith.constant 0 : i32
    return %c0_i32, %c0_i32_0 : i32, i32
  }
  func.func @transform_16(%arg0: i32) -> (i32, i32) {
    %c0_i32 = arith.constant 0 : i32
    %c0_i32_0 = arith.constant 0 : i32
    %c0_i32_1 = arith.constant 0 : i32
    return %c0_i32, %c0_i32_0 : i32, i32
  }
  func.func @transform_17(%arg0: i32) -> (i32, i32, i32) {
    %c0_i32 = arith.constant 0 : i32
    %c0_i32_0 = arith.constant 0 : i32
    %c0_i32_1 = arith.constant 0 : i32
    return %arg0, %c0_i32, %c0_i32_0 : i32, i32, i32
  }
  func.func @transform_18(%arg0: i32) -> (i32, i32, i32) {
    %c0_i32 = arith.constant 0 : i32
    %c0_i32_0 = arith.constant 0 : i32
    %c0_i32_1 = arith.constant 0 : i32
    return %arg0, %c0_i32, %c0_i32_0 : i32, i32, i32
  }
}

</mosaic_0001>

<bundles_post_ra>
// kernel: transformer_feature_block.1
= control target key start
LH: loop header
LB: loop body
LE: loop exit
PB: predicated region body
PF: predicated region fallthrough
CT: control target
= control target key end

     0   :  { %s2650_s0 = inlined_call_operand.vmem [shape: f32[2,8,32], index: 0, kind: input, shape index: {}]   ;;  %s2651_s1 = inlined_call_operand.vmem [shape: bf16[32,32], index: 1, kind: input, shape index: {}]   ;;  %s2652_s2 = inlined_call_operand.vmem [shape: bf16[32,32], index: 2, kind: input, shape index: {}]   ;;  %s2653_s3 = inlined_call_operand.vmem [shape: bf16[32,32], index: 3, kind: input, shape index: {}]   ;;  %s2654_s4 = inlined_call_operand.hbm [shape: f32[1,32], index: 4, kind: input, shape index: {}]   ;;  %s2655_s5 = inlined_call_operand.hbm [shape: f32[1,32], index: 5, kind: input, shape index: {}]   ;;  %s2656_s6 = inlined_call_operand.hbm [shape: f32[1,32], index: 6, kind: input, shape index: {}]   ;;  %s2657_s7 = inlined_call_operand.vmem [shape: bf16[32,32], index: 7, kind: input, shape index: {}]   ;;  %s2658_s8 = inlined_call_operand.hbm [shape: f32[1,32], index: 8, kind: input, shape index: {}]   ;;  %s2659_s9 = inlined_call_operand.hbm [shape: f32[1,32], index: 9, kind: input, shape index: {}]   ;;  %s2660_s10 = inlined_call_operand.hbm [shape: f32[1,32], index: 10, kind: input, shape index: {}]   ;;  %s2661_s11 = inlined_call_operand.vmem [shape: bf16[32,128], index: 11, kind: input, shape index: {}]   ;;  %s2662_s12 = inlined_call_operand.hbm [shape: f32[1,128], index: 12, kind: input, shape index: {}]   ;;  %s2663_s13 = inlined_call_operand.vmem [shape: bf16[128,32], index: 13, kind: input, shape index: {}]   ;;  %s2664_s14 = inlined_call_operand.hbm [shape: f32[1,32], index: 14, kind: input, shape index: {}]   ;;  %s2665_s15 = inlined_call_operand.vmem [shape: f32[1,32], index: 15, kind: input, shape index: {}]   ;;  %s2666_s16 = inlined_call_operand.hbm [shape: f32[1,32], index: 16, kind: input, shape index: {}]   ;;  %s2667_s17 = inlined_call_operand.hbm [shape: f32[2,8,32], index: 17, kind: output, shape index: {0}]   ;;  %s2668_s18 = inlined_call_operand.hbm [shape: f32[2,8,8], index: 18, kind: output, shape index: {1}]  }
   0x1   :  { %2683 = sst [smem:[#allocation33_spill]] %s2650_s0 }
   0x2   :  { %2684 = sst [smem:[#allocation34_spill]] %s2651_s1 }
   0x3   :  { %2685 = sst [smem:[#allocation35_spill]] %s2652_s2 }
   0x4   :  { %2686 = sst [smem:[#allocation36_spill]] %s2653_s3 }
   0x5   :  { %2687 = sst [smem:[#allocation37_spill]] %s2654_s4 }
   0x6   :  { %2688 = sst [smem:[#allocation38_spill]] %s2655_s5 }
   0x7   :  { %24 = vsyncpa [#allocation3], 0 }
   0x8   :  { %25 = vsyncpa [#allocation6], 0 }
   0x9   :  { %26 = vsyncpa [#allocation9], 0 }
   0xa   :  { %27 = vsyncpa [#allocation12], 0 }
   0xb   :  { %28 = vsyncpa [#allocation15], 0 }
   0xc   :  { %29 = vsyncpa [#allocation4], 0 }
   0xd   :  { %31 = vsyncpa [#allocation4 + $0x1], 0 }
   0xe   :  { %32 = vsyncpa [#allocation19], 0 }
   0xf   :  { %34 = vsyncpa [#allocation19 + $0x1], 0  ;;  %s2305_s27 = smov 0   ;;  %s2307_s28 = smov 0  }
  0x10   :  { %s2309_s29 = smov 0   ;;  %s2311_s30 = smov 0  }
  0x11 LB: > { %2689 = sst [smem:[#allocation27_spill]] %s2183_s27  ;;  %s2326_s0 = sadd.s32 4294967295, %s2195_s30   ;;  %s2195_s30 = sphi %s2311_s30, %s2725_s30   ;;  %s2191_s29 = sphi %s2309_s29, %s2727_s29   ;;  %s2187_s28 = sphi %s2307_s28, %s2729_s28   ;;  %s2183_s27 = sphi %s2305_s27, %s2728_s27  }
  0x12   : > { %2690 = sst [smem:[#allocation28_spill]] %s2191_s29  ;;  %s1522_s19 = sadd.s32 4294967294, %s2195_s30  }
  0x13   : > { %2691 = sst [smem:[#allocation29_spill]] %s2195_s30  ;;  %s2330_s1 = sadd.s32 1, %s2195_s30  }
  0x14   : > { %2692 = sst [smem:[#allocation30_spill]] %s2330_s1  ;;  %s409_s20 = sadd.s32 1, %s2191_s29 }
  0x15   : > { %s406_s21 = ssub.s32 %s2195_s30, %s2330_s1  ;;  %p419_p0 = scmp.ne.s32.totalorder %s2191_s29, %s2187_s28 }
  0x16   : > { %p407_p1 = scmp.eq.s32.totalorder %s406_s21, 0  ;;  %p420_p2 = scmp.eq.s32.totalorder %s2326_s0, 1 }
  0x17   : > { %p425_p3 = scmp.ne.s32.totalorder %s2187_s28, %s2183_s27  ;;  %p426_p4 = scmp.eq.s32.totalorder %s1522_s19, 1 }
  0x18   : > { %s2341_s22 = scalar_select %p407_p1, %s2191_s29, %s409_s20  }
  0x19   : > { %p2343_p5 = por %p420_p2, %p419_p0  ;;  %p2347_p6 = por %p426_p4, %p425_p3 }
  0x1a   : > { %2693 = sst [smem:[#allocation31_spill]] %s2341_s22  ;;  %p1523_p7 = scmp.ge.s32.totalorder %s2195_s30, 1 }
  0x1b   : > { %s2694_s2 = scalar_select %p2343_p5, 1, 0 }
  0x1c   : > { %s2695_s23 = scalar_select %p2347_p6, 1, 0 }
  0x1d   : > { %p459_p8 = scmp.lt.s32.totalorder %s2195_s30, 3  ;;  %p2676_p9 = scmp.eq.s32.totalorder %s2326_s0, 0 }
  0x1e   : > { %2696 = sst [smem:[#allocation32_spill]] %s2695_s23  ;;  %s2197_s25 = smov [#allocation5]  }
  0x1f   : > { %p2354_p10 = pnand %p1523_p7, %p459_p8  ;;  %s492_s26 = sshll.u32 %s2197_s25, 4  ;;  %s493_s26 = int_to_ptr.vmem [resolvable:$true] %s492_s26 }
  0x20   : > { %s2198_s19 = smov [#allocation8]   ;;  %s2199_s22 = smov [#allocation11]  }
  0x21   : > { %s2697_s24 = scalar_select %p2354_p10, 1, 0 }
  0x22   : > { %p1728_p11 = pneg %p2354_p10  ;;  %s517_s20 = sshll.u32 %s2198_s19, 4  ;;  %s518_s20 = int_to_ptr.vmem [resolvable:$true] %s517_s20 }
  0x23   : > { %s539_s29 = sshll.u32 %s2199_s22, 4  ;;  %s1862_s25 = scalar_lea.vmem %s493_s26, 16  ;;  %s2366_s29 = int_to_ptr.vmem [resolvable:$true] %s539_s29 }
  0x24   : > { %p2362_p12 = pnand %p2676_p9, %p1728_p11  ;;  %p1863_p0 = scmp.ne.s32.totalorder %s493_s26, %s1862_s25 }
  0x25   : > { %s1869_s19 = scalar_lea.vmem %s493_s26, 32  ;;  %p1870_p3 = scmp.lt.s32.totalorder %s493_s26, %s493_s26 }
  0x26   : > { %p2370_p13 = pneg %p2362_p12  ;;  %p1871_p4 = scmp.lt.s32.totalorder %s1869_s19, %s1862_s25 }
  0x28   : > { %p1865_p1 = pnand %p1863_p0, %p2370_p13  ;;  %p1872_p7 = por %p1871_p4, %p1870_p3 }
  0x2a   : > { %p1866_p2 = pneg %p1865_p1 }
  0x2c   : > { %p1873_p8 = pnand %p1872_p7, %p1866_p2 }
  0x2e   : > { %1876 = shalt.err (!%p1873_p8)
}
  0x2f   : > { %s2700_s5 = sld [smem:[#allocation38_spill]]  ;;  %s1888_s27 = scalar_lea.vmem %s518_s20, 16 }
  0x30   : > { %p1889_p11 = scmp.ne.s32.totalorder %s518_s20, %s1888_s27  ;;  %s1895_s30 = scalar_lea.vmem %s518_s20, 32 }
  0x31   : > { %p1896_p0 = scmp.lt.s32.totalorder %s518_s20, %s518_s20  ;;  %p1897_p1 = scmp.lt.s32.totalorder %s1895_s30, %s1888_s27 }
  0x32   : > { %p1891_p9 = pnand %p1889_p11, %p2370_p13 }
  0x33   : > { %p1898_p5 = por %p1897_p1, %p1896_p0 }
  0x34   : > { %p1892_p6 = pneg %p1891_p9 }
  0x35   : > { %1734 = dma.hbm_to_vmem [thread:$0]  (!%p2362_p12), %s2700_s5, 16, %s493_s26, [#allocation6]  }
  0x36   : > { %p1899_p10 = pnand %p1898_p5, %p1892_p6 }
  0x38   : > { %1902 = shalt.err (!%p1899_p10)
}
  0x39   : > { %1740 = dma.hbm_to_vmem [thread:$0]  (!%p2362_p12), %s2658_s8, 16, %s518_s20, [#allocation9]  }
  0x3a   : > { %s1914_s23 = scalar_lea.vmem %s2366_s29, 16  ;;  %s1921_s27 = scalar_lea.vmem %s2366_s29, 32 }
  0x3b   : > { %p1915_p2 = scmp.ne.s32.totalorder %s2366_s29, %s1914_s23  ;;  %p1922_p5 = scmp.lt.s32.totalorder %s2366_s29, %s2366_s29 }
  0x3c   : > { %p1923_p6 = scmp.lt.s32.totalorder %s1921_s27, %s1914_s23 }
  0x3d   : > { %p1917_p9 = pnand %p1915_p2, %p2370_p13 }
  0x3e   : > { %p1924_p10 = por %p1923_p6, %p1922_p5 }
  0x3f   : > { %p1918_p3 = pneg %p1917_p9 }
  0x41   : > { %p1925_p4 = pnand %p1924_p10, %p1918_p3 }
  0x43   : > { %1928 = shalt.err (!%p1925_p4)
}
  0x44   : > { %1746 = dma.hbm_to_vmem [thread:$0]  (!%p2362_p12), %s2660_s10, 16, %s2366_s29, [#allocation12]  }
  0x45   : > { %s2200_s20 = smov [#allocation14]   ;;  %s2201_s25 = smov [#allocation2]  }
  0x46   : > { %s567_s22 = sshll.u32 %s2200_s20, 4  ;;  %s481_s19 = sshll.u32 %s2201_s25, 4  ;;  %s568_s22 = int_to_ptr.vmem [resolvable:$true] %s567_s22  ;;  %s482_s19 = int_to_ptr.vmem [resolvable:$true] %s481_s19 }
  0x47   : > { %s1940_s5 = scalar_lea.vmem %s568_s22, 16  ;;  %s1947_s23 = scalar_lea.vmem %s568_s22, 32 }
  0x48   : > { %p1941_p7 = scmp.ne.s32.totalorder %s568_s22, %s1940_s5  ;;  %p1948_p0 = scmp.lt.s32.totalorder %s568_s22, %s568_s22 }
  0x49   : > { %p1949_p1 = scmp.lt.s32.totalorder %s1947_s23, %s1940_s5 }
  0x4a   : > { %p1943_p8 = pnand %p1941_p7, %p2370_p13 }
  0x4b   : > { %p1950_p2 = por %p1949_p1, %p1948_p0 }
  0x4c   : > { %p1944_p11 = pneg %p1943_p8 }
  0x4e   : > { %p1951_p9 = pnand %p1950_p2, %p1944_p11 }
  0x50   : > { %1954 = shalt.err (!%p1951_p9)
}
  0x51   : > { %1752 = dma.hbm_to_vmem [thread:$0]  (!%p2362_p12), %s2664_s14, 16, %s568_s22, [#allocation15]  }
  0x52   : > { %s1966_s30 = scalar_lea.vmem %s482_s19, 16  ;;  %s1973_s26 = scalar_lea.vmem %s482_s19, 32 }
  0x53   : > { %p1967_p3 = scmp.ne.s32.totalorder %s482_s19, %s1966_s30  ;;  %p1974_p10 = scmp.lt.s32.totalorder %s482_s19, %s482_s19 }
  0x54   : > { %p1975_p4 = scmp.lt.s32.totalorder %s1973_s26, %s1966_s30 }
  0x55   : > { %p1969_p5 = pnand %p1967_p3, %p2370_p13 }
  0x56   : > { %p1976_p7 = por %p1975_p4, %p1974_p10 }
  0x57   : > { %p1970_p6 = pneg %p1969_p5 }
  0x59   : > { %p1977_p8 = pnand %p1976_p7, %p1970_p6 }
  0x5b   : > { %1980 = shalt.err (!%p1977_p8)
}
  0x5c   : > { %s2701_s4 = sld [smem:[#allocation37_spill]]  ;;  %s2202_s22 = smov [#allocation7]  }
  0x5d   : > { %s503_s25 = sshll.u32 %s2202_s22, 4  ;;  %s2203_s23 = smov [#allocation10]   ;;  %s504_s25 = int_to_ptr.vmem [resolvable:$true] %s503_s25 }
  0x5e   : > { %s528_s27 = sshll.u32 %s2203_s23, 4  ;;  %s1992_s29 = scalar_lea.vmem %s504_s25, 16  ;;  %s529_s27 = int_to_ptr.vmem [resolvable:$true] %s528_s27 }
  0x5f   : > { %p1993_p11 = scmp.ne.s32.totalorder %s504_s25, %s1992_s29  ;;  %s1999_s30 = scalar_lea.vmem %s504_s25, 32 }
  0x60   : > { %p2000_p2 = scmp.lt.s32.totalorder %s504_s25, %s504_s25  ;;  %p2001_p9 = scmp.lt.s32.totalorder %s1999_s30, %s1992_s29 }
  0x61   : > { %p1995_p0 = pnand %p1993_p11, %p2370_p13 }
  0x62   : > { %1731 = dma.hbm_to_vmem [thread:$0]  (!%p2362_p12), %s2701_s4, 16, %s482_s19, [#allocation3]  }
  0x63   : > { %p1996_p1 = pneg %p1995_p0  ;;  %p2002_p3 = por %p2001_p9, %p2000_p2 }
  0x65   : > { %p2003_p5 = pnand %p2002_p3, %p1996_p1 }
  0x67   : > { %2006 = shalt.err (!%p2003_p5)
}
  0x68   : > { %1737 = dma.hbm_to_vmem [thread:$0]  (!%p2362_p12), %s2656_s6, 16, %s504_s25, [#allocation6]  }
  0x69   : > { %s2018_s5 = scalar_lea.vmem %s529_s27, 16  ;;  %s2025_s20 = scalar_lea.vmem %s529_s27, 32 }
  0x6a   : > { %p2019_p6 = scmp.ne.s32.totalorder %s529_s27, %s2018_s5  ;;  %p2026_p7 = scmp.lt.s32.totalorder %s529_s27, %s529_s27 }
  0x6b   : > { %p2027_p8 = scmp.lt.s32.totalorder %s2025_s20, %s2018_s5 }
  0x6c   : > { %p2021_p10 = pnand %p2019_p6, %p2370_p13 }
  0x6d   : > { %p2028_p11 = por %p2027_p8, %p2026_p7 }
  0x6e   : > { %p2022_p4 = pneg %p2021_p10 }
  0x70   : > { %p2029_p0 = pnand %p2028_p11, %p2022_p4 }
  0x72   : > { %2032 = shalt.err (!%p2029_p0)
}
  0x73   : > { %1743 = dma.hbm_to_vmem [thread:$0]  (!%p2362_p12), %s2659_s9, 16, %s529_s27, [#allocation9]  }
  0x74   : > { %s2204_s25 = smov [#allocation13]   ;;  %s2205_s30 = smov [#allocation16]  }
  0x75   : > { %s553_s29 = sshll.u32 %s2204_s25, 4  ;;  %s581_s26 = sshll.u32 %s2205_s30, 4  ;;  %s554_s29 = int_to_ptr.vmem [resolvable:$true] %s553_s29  ;;  %s582_s26 = int_to_ptr.vmem [resolvable:$true] %s581_s26 }
  0x76   : > { %s2044_s19 = scalar_lea.vmem %s554_s29, 16  ;;  %s2051_s5 = scalar_lea.vmem %s554_s29, 32 }
  0x77   : > { %p2045_p1 = scmp.ne.s32.totalorder %s554_s29, %s2044_s19  ;;  %p2052_p3 = scmp.lt.s32.totalorder %s554_s29, %s554_s29 }
  0x78   : > { %p2053_p5 = scmp.lt.s32.totalorder %s2051_s5, %s2044_s19 }
  0x79   : > { %p2047_p2 = pnand %p2045_p1, %p2370_p13 }
  0x7a   : > { %p2054_p6 = por %p2053_p5, %p2052_p3 }
  0x7b   : > { %p2048_p9 = pneg %p2047_p2 }
  0x7d   : > { %p2055_p10 = pnand %p2054_p6, %p2048_p9 }
  0x7f   : > { %2058 = shalt.err (!%p2055_p10)
}
  0x80   : > { %1749 = dma.hbm_to_vmem [thread:$0]  (!%p2362_p12), %s2662_s12, 16, %s554_s29, [#allocation12]  }
  0x81   : > { %s2070_s22 = scalar_lea.vmem %s582_s26, 16  ;;  %s2077_s23 = scalar_lea.vmem %s582_s26, 32 }
  0x82   : > { %p2071_p4 = scmp.ne.s32.totalorder %s582_s26, %s2070_s22  ;;  %p2078_p11 = scmp.lt.s32.totalorder %s582_s26, %s582_s26 }
  0x83   : > { %p2079_p0 = scmp.lt.s32.totalorder %s2077_s23, %s2070_s22 }
  0x84   : > { %p2073_p7 = pnand %p2071_p4, %p2370_p13 }
  0x85   : > { %p2080_p1 = por %p2079_p0, %p2078_p11 }
  0x86   : > { %p2074_p8 = pneg %p2073_p7 }
  0x88   : > { %p2081_p2 = pnand %p2080_p1, %p2074_p8 }
  0x8a   : > { %2084 = shalt.err (!%p2081_p2)
}
  0x8b   : > { %1755 = dma.hbm_to_vmem [thread:$0]  (!%p2362_p12), %s2666_s16, 16, %s582_s26, [#allocation15]  }
  0x8c   : > { %p2702_p9 = scmp.ne.s32.totalorder %s2697_s24, 0 }
  0x8d   : > { %p2703_p3 = scmp.eq.s32.totalorder (!%p2702_p9), %s2326_s0, 0 }
  0x8e   : > { %601 = sbr.rel (%p2702_p9) target bundleno = 2316 (0x90c), region = 88 }
  0x93   : > { %2154 = dma.done.wait (%p2703_p3), [#allocation3], 16   ;;  %p2704_p13 = pmov %p2703_p3 }
  0x94   : > { %p2705_p5 = pmov %p2703_p3 }
  0x95   : > { %2156 = vsyncadd (%p2704_p13), [#allocation3], 4294967280 }
  0x96   : > { %2158 = dma.done.wait (%p2705_p5), [#allocation6], 32   ;;  %p2706_p6 = pmov %p2703_p3 }
  0x97   : > { %p2707_p10 = pmov %p2703_p3 }
  0x98   : > { %2160 = vsyncadd (%p2706_p6), [#allocation6], 4294967264 }
  0x99   : > { %2162 = dma.done.wait (%p2707_p10), [#allocation9], 32   ;;  %p2708_p12 = pmov %p2703_p3 }
  0x9a   : > { %p2709_p4 = pmov %p2703_p3 }
  0x9b   : > { %2164 = vsyncadd (%p2708_p12), [#allocation9], 4294967264 }
  0x9c   : > { %2166 = dma.done.wait (%p2709_p4), [#allocation12], 32   ;;  %p2710_p7 = pmov %p2703_p3 }
  0x9d   : > { %p2711_p8 = pmov %p2703_p3 }
  0x9e   : > { %2168 = vsyncadd (%p2710_p7), [#allocation12], 4294967264 }
  0x9f   : > { %2170 = dma.done.wait (%p2711_p8), [#allocation15], 32   ;;  %p2712_p11 = pmov %p2703_p3 }
  0xa0   : > { %p691_p0 = scmp.lt.s32.totalorder %s2326_s0, 1  ;;  %v2206_v0 = vmov 0.0   ;;  %vm2207_vm0 = vmmov 0   ;;  %s2713_s26 = sld [smem:[#allocation33_spill]]  ;;  %vm721_vm1 = vcmask 261120   ;;  %vm941_vm2 = vcmask 64512  }
  0xa1   : > { %2172 = vsyncadd (%p2712_p11), [#allocation15], 4294967264  ;;  %1616 = vmatprep.subr.bf16.mxu0 %v2206_v0  ;;  %1620 = vmatprep.mubr.msk.bf16.mxu0 %vm2207_vm0, %v2206_v0  ;;  %s2714_s27 = sld [smem:[#allocation34_spill]]  ;;  %v1551_v11 = vld [vmem:[#allocation5] ss:$0 sm:$0xff]  ;;  %vm957_vm3 = vcmask 1043456  }
  0xa2   : > { %s692_s1 = scalar_select %p691_p0, %s2326_s0, 1  ;;  %1640 = vmatprep.subr.bf16.mxu1 %v2206_v0  ;;  %1642 = vmatprep.mubr.msk.bf16.mxu1 %vm2207_vm0, %v2206_v0  ;;  %v1547_v16 = vld [vmem:[#allocation2] ss:$0 sm:$0xff]  ;;  %v1555_v35 = vld [vmem:[#allocation7] ss:$0 sm:$0xff]  ;;  %v1831_v43 = vld [vmem:[%s2657_s7 + $0x8] sm:$0xff]  }
  0xa3   : > { %s2716_s4 = sld [smem:[#allocation35_spill]]  ;;  %s2526_s23 = sand.u32 1, %s2187_s28   ;;  %v1832_v48 = vld [vmem:[%s2657_s7] sm:$0xff]  }
  0xa4   : > { %s1546_s24 = sshll.u32 %s692_s1, 3  ;;  %s2717_s3 = sld [smem:[#allocation36_spill]]  ;;  %v1561_v54 = vld [vmem:[#allocation8] ss:$0 sm:$0xff] }
  0xa5   : > { %s2680_s25 = sshll.u32 %s2526_s23, 3  ;;  %s1317_s1 = scalar_lea.sflag [#allocation19], %s2526_s23 }
  0xa6   : > { %s694_s19 = scalar_lea.vmem %s2713_s26, %s1546_s24  ;;  %s2531_s30 = scalar_lea.vmem [#allocation18], %s2680_s25 }
  0xa7   : > { %s2715_s22 = smov %s2714_s27  ;;  %v1825_v1 = vld [vmem:[%s2714_s27 + $0x8] sm:$0xff]   ;;  %v2482_v3 = vld [vmem:[%s694_s19] sm:$0xff]  ;;  %s2681_s26 = sshll.u32 %s2326_s0, 7 }
  0xa8   : > { %v1826_v2 = vld [vmem:[%s2715_s22] sm:$0xff]   ;;  %1617 = vmatpush3.bf16.msra.mxu0 %v1825_v1  ;;  %v697_v5 = vpack.c.bf16 %v2482_v3, %v2482_v3  ;;  %s1341_s20 = scalar_lea.hbm %s2668_s18, %s2681_s26  ;;  %s1343_s27 = sshll.u32 %s2531_s30, 4  ;;  %s1344_s27 = int_to_ptr.vmem [resolvable:$true] %s1343_s27 }
  0xa9   : > { %1618 = vmatprep.subr.bf16.mxu0 %v2206_v0  ;;  %v1827_v4 = vld [vmem:[%s2716_s4 + $0x8] sm:$0xff]   ;;  %v1828_v6 = vld [vmem:[%s2716_s4] sm:$0xff]   ;;  %s2085_s24 = scalar_lea.vmem %s1344_s27, 128  ;;  %p2718_p2 = scmp.ne.s32.totalorder %s2694_s2, 0 }
  0xaa   : > { %v1829_v22 = vld [vmem:[%s2717_s3 + $0x8] sm:$0xff]   ;;  %v1830_v23 = vld [vmem:[%s2717_s3] sm:$0xff]   ;;  %p2086_p1 = scmp.ne.s32.totalorder %s1344_s27, %s2085_s24  ;;  %s2208_s21 = smov [#allocation18]  }
  0xab   : > { %s2089_s29 = sshll.u32 %s2208_s21, 4  ;;  %s2090_s29 = int_to_ptr.vmem [resolvable:$false] %s2089_s29 }
  0xac   : > { %1619 = vmatpush3.bf16.msra.mxu0 %v1826_v2  ;;  %p2087_p9 = pnand %p2086_p1, %p2718_p2  ;;  %s2091_s25 = scalar_lea.vmem %s2090_s29, 256 }
  0xad   : > { %1624 = vmatprep.subr.bf16.mxu0 %v2206_v0  ;;  %p2092_p13 = scmp.lt.s32.totalorder %s1344_s27, %s2090_s29  ;;  %p2093_p5 = scmp.lt.s32.totalorder %s2091_s25, %s2085_s24 }
  0xae   : > { %p2088_p3 = pneg %p2087_p9 }
  0xaf   : > { %1621 = vmatmul.mubr.msk.bf16.vlgmr.msra.gmra.mxu0 %vm721_vm1, %v697_v5  ;;  %p2094_p6 = por %p2093_p5, %p2092_p13 }
  0xb0   : > { %1625 = vmatpush3.bf16.msra.mxu0 %v1827_v4  ;;  %1628 = vmatprep.mubr.msk.bf16.mxu0 %vm2207_vm0, %v2206_v0 }
  0xb1   : > { %1626 = vmatprep.subr.bf16.mxu0 %v2206_v0  ;;  %p2095_p10 = pnand %p2094_p6, %p2088_p3 }
  0xb4   : > { %1627 = vmatpush3.bf16.msra.mxu0 %v1828_v6  ;;  %v1835_v6 = vld [vmem:[%s2663_s13 + $0x38] sm:$0xff]  }
  0xb5   : > { %1632 = vmatprep.subr.bf16.mxu0 %v2206_v0 }
  0xb7   : > { %1629 = vmatmul.mubr.msk.bf16.vlgmr.msra.gmra.mxu0 %vm721_vm1, %v697_v5 }
  0xb8   : > { %1636 = vmatprep.mubr.msk.bf16.mxu0 %vm2207_vm0, %v2206_v0  ;;  %1633 = vmatpush3.bf16.msra.mxu0 %v1829_v22  ;;  %v1841_v22 = vld [vmem:[%s2663_s13 + $0x8] sm:$0xff]  }
  0xb9   : > { %1634 = vmatprep.subr.bf16.mxu0 %v2206_v0 }
  0xbc   : > { %1635 = vmatpush3.bf16.msra.mxu0 %v1830_v23  ;;  %v1842_v23 = vld [vmem:[%s2663_s13] sm:$0xff]  }
  0xbd   : > { %1646 = vmatprep.subr.bf16.mxu0 %v2206_v0 }
  0xbf   : > { %1637 = vmatmul.mubr.msk.bf16.vlgmr.msra.gmra.mxu0 %vm721_vm1, %v697_v5  ;;  %v1833_v5 = vld [vmem:[%s2661_s11 + $0x8] sm:$0xff]  }
  0xc0   : > { %1648 = vmatprep.mubr.msk.bf16.mxu0 %vm2207_vm0, %v2206_v0 }
 0x16f   : > { %v759_v7 = vpop.f32.mrf.mxu0 }
 0x170   : > { %v760_v20 = vadd.f32 %v1547_v16, %v759_v7  ;;  %v1836_v7 = vld [vmem:[%s2663_s13 + $0x30] sm:$0xff]   ;;  %v1565_v16 = vld [vmem:[#allocation10] ss:$0 sm:$0xff] }
 0x171   : > { %v1622_v8 = vpop.f32.mrf.mxu0 }
 0x172   : > { %v891_v21 = vpack.c.bf16 %v760_v20, %v760_v20  ;;  %v1837_v8 = vld [vmem:[%s2663_s13 + $0x28] sm:$0xff]  }
 0x173   : > { %v762_v9 = vpop.f32.mrf.mxu0 }
 0x174   : > { %v1838_v9 = vld [vmem:[%s2663_s13 + $0x20] sm:$0xff]  }
 0x175   : > { %v1623_v10 = vpop.f32.mrf.mxu0 }
 0x176   : > { %v1839_v10 = vld [vmem:[%s2663_s13 + $0x18] sm:$0xff]  }
 0x177   : > { %v822_v12 = vpop.f32.mrf.mxu0 }
 0x178   : > { %v823_v13 = vadd.f32 %v1551_v11, %v822_v12  ;;  %v1840_v11 = vld [vmem:[%s2663_s13 + $0x10] sm:$0xff]  }
 0x179   : > { %v1630_v14 = vpop.f32.mrf.mxu0 }
 0x17a   : > { %v892_v15 = vpack.c.bf16 %v823_v13, %v823_v13 }
 0x17b   : > { %v825_v17 = vpop.f32.mrf.mxu0 }
 0x17c   : > { %v898_v18 = vsel %vm721_vm1, %v892_v15, 0 }
 0x17d   : > { %v1631_v19 = vpop.f32.mrf.mxu0  ;;  %1641 = vmatpush3.bf16.xpose.msra.mxu1 %v898_v18  ;;  %v1566_v18 = vld [vmem:[#allocation11] ss:$0 sm:$0xff] }
 0x17e   : > { %1652 = vmatprep.subr.bf16.mxu1 %v2206_v0 }
 0x17f   : > { %v885_v36 = vpop.f32.mrf.mxu0 }
 0x180   : > { %v886_v37 = vadd.f32 %v1555_v35, %v885_v36 }
 0x181   : > { %v1638_v38 = vpop.f32.mrf.mxu0 }
 0x182   : > { %v893_v39 = vpack.c.bf16 %v886_v37, %v886_v37 }
 0x183   : > { %v888_v40 = vpop.f32.mrf.mxu0 }
 0x184   : > { %1643 = vmatmul.mubr.msk.bf16.vlgmr.msra.gmra.mxu1 %vm721_vm1, %v891_v21  ;;  %v959_v41 = vsel %vm957_vm3, %v893_v39, 0 }
 0x185   : > { %1656 = vmatprep.mubr.msk.bf16.mxu1 %vm2207_vm0, %v2206_v0  ;;  %v1639_v42 = vpop.f32.mrf.mxu0  ;;  %1647 = vmatpush3.bf16.msra.mxu0 %v959_v41 }
 0x186   : > { %1660 = vmatprep.subr.bf16.mxu0 %v2206_v0  ;;  %1653 = vmatpush3.bf16.msra.mxu1 %v1831_v43 }
 0x187   : > { %1654 = vmatprep.subr.bf16.mxu1 %v2206_v0 }
 0x18a   : > { %1655 = vmatpush3.bf16.msra.mxu1 %v1832_v48 }
 0x18b   : > { %1668 = vmatprep.subr.bf16.mxu1 %v2206_v0 }
 0x244   : > { %v934_v24 = vpop.f32.mrf.mxu1 }
 0x245   : > { %v940_v25 = vmul.f32 0.17677669, %v934_v24  ;;  %v1567_v24 = vld [vmem:[#allocation13] ss:$0 sm:$0xff] }
 0x246   : > { %v1644_v26 = vpop.f32.mrf.mxu1 }
 0x247   : > { %v942_v27 = vsel %vm941_vm2, %v940_v25, -inf }
 0x248   : > { %943 = vmax.xlane.f32.xlu0 %v942_v27  ;;  %v937_v28 = vpop.f32.mrf.mxu1 }
 0x24a   : > { %v1645_v29 = vpop.f32.mrf.mxu1 }
 0x2d1   : > { %v944_v30 = vpop.xlane.xlu0 %943 }
 0x2d2   : > { %v945_v31 = vsub.f32 %v940_v25, %v944_v30 }
 0x2d4   : > { %v946_v32 = vmul.f32 1.442695, %v945_v31 }
 0x2d6   : > { %1843 = vpow2.f32 %v946_v32  ;;  %v1571_v32 = vld [vmem:[#allocation14] ss:$0 sm:$0xff] }
 0x2e3   : > { %v1844_v33 = vpop.eup %1843 }
 0x2e4   : > { %v948_v34 = vsel %vm941_vm2, %v1844_v33, 0.0 }
 0x2e5   : > { %949 = vadd.xlane.f32.xlu0 %v948_v34 }
 0x36e   : > { %v950_v44 = vpop.xlane.xlu0 %949 }
 0x36f   : > { %1845 = vrcp.f32 %v950_v44 }
 0x37c   : > { %v1846_v45 = vpop.eup %1845 }
 0x37d   : > { %v952_v46 = vmul.f32 %v1846_v45, %v1844_v33 }
 0x37f   : > { %v953_v47 = vpack.c.bf16 %v952_v46, %v952_v46  ;;  %1310 = vst.msk [vmem:[%s2531_s30] sm:$0xff] %vm941_vm2, %v952_v46 }
 0x381   : > { %1649 = vmatmul.mubr.msk.bf16.vlgmr.msra.gmra.mxu0 %vm941_vm2, %v953_v47 }
 0x382   : > { %1664 = vmatprep.mubr.msk.bf16.mxu0 %vm2207_vm0, %v2206_v0  ;;  %1661 = vmatpush3.bf16.msra.mxu0 %v1833_v5 }
 0x383   : > { %1662 = vmatprep.subr.bf16.mxu0 %v2206_v0 }
 0x441   : > { %v995_v49 = vpop.f32.mrf.mxu0 }
 0x442   : > { %v1001_v50 = vpack.c.bf16 %v995_v49, %v995_v49 }
 0x443   : > { %v1650_v51 = vpop.f32.mrf.mxu0 }
 0x444   : > { %1657 = vmatmul.mubr.msk.bf16.vlgmr.msra.gmra.mxu1 %vm721_vm1, %v1001_v50 }
 0x445   : > { %v998_v52 = vpop.f32.mrf.mxu0  ;;  %1684 = vmatprep.mubr.msk.bf16.mxu1 %vm2207_vm0, %v2206_v0  ;;  %1669 = vmatpush3.bf16.msra.mxu1 %v1835_v6 }
 0x446   : > { %1670 = vmatprep.subr.bf16.mxu1 %v2206_v0 }
 0x447   : > { %v1651_v53 = vpop.f32.mrf.mxu0 }
 0x449   : > { %1671 = vmatpush3.bf16.msra.mxu1 %v1836_v7 }
 0x44a   : > { %1672 = vmatprep.subr.bf16.mxu1 %v2206_v0 }
 0x44d   : > { %1673 = vmatpush3.bf16.msra.mxu1 %v1837_v8 }
 0x44e   : > { %1674 = vmatprep.subr.bf16.mxu1 %v2206_v0 }
 0x451   : > { %1675 = vmatpush3.bf16.msra.mxu1 %v1838_v9 }
 0x452   : > { %1676 = vmatprep.subr.bf16.mxu1 %v2206_v0 }
 0x455   : > { %1677 = vmatpush3.bf16.msra.mxu1 %v1839_v10 }
 0x456   : > { %1678 = vmatprep.subr.bf16.mxu1 %v2206_v0 }
 0x459   : > { %1679 = vmatpush3.bf16.msra.mxu1 %v1840_v11 }
 0x45a   : > { %1680 = vmatprep.subr.bf16.mxu1 %v2206_v0 }
 0x45d   : > { %1681 = vmatpush3.bf16.msra.mxu1 %v1841_v22 }
 0x45e   : > { %1682 = vmatprep.subr.bf16.mxu1 %v2206_v0 }
 0x461   : > { %1683 = vmatpush3.bf16.msra.mxu1 %v1842_v23 }
 0x504   : > { %v1062_v55 = vpop.f32.mrf.mxu1 }
 0x505   : > { %v1063_v56 = vadd.f32 %v1561_v54, %v1062_v55 }
 0x506   : > { %v1658_v57 = vpop.f32.mrf.mxu1 }
 0x507   : > { %v1068_v58 = vadd.f32 %v1063_v56, %v2482_v3  ;;  %v1834_v3 = vld [vmem:[%s2661_s11] sm:$0xff]  }
 0x508   : > { %v1065_v59 = vpop.f32.mrf.mxu1  ;;  %1663 = vmatpush3.bf16.msra.mxu0 %v1834_v3 }
 0x509   : > { %v1071_v60 = vsel %vm721_vm1, %v1068_v58, 0.0 }
 0x50a   : > { %1072 = vadd.xlane.f32.xlu1 %v1071_v60  ;;  %v1659_v61 = vpop.f32.mrf.mxu1 }
 0x593   : > { %v1073_v62 = vpop.xlane.xlu1 %1072 }
 0x594   : > { %v1075_v63 = vmul.f32 0.03125, %v1073_v62 }
 0x596   : > { %v1076_v1 = vsub.f32 %v1068_v58, %v1075_v63 }
 0x598   : > { %v1077_v2 = vmul.f32 %v1076_v1, %v1076_v1 }
 0x59a   : > { %v1078_v4 = vsel %vm721_vm1, %v1077_v2, 0.0 }
 0x59b   : > { %1079 = vadd.xlane.f32.xlu1 %v1078_v4 }
 0x624   : > { %v1080_v12 = vpop.xlane.xlu1 %1079 }
 0x625   : > { %v1081_v13 = vmul.f32 0.03125, %v1080_v12 }
 0x627   : > { %v1082_v14 = vadd.f32 1e-05, %v1081_v13 }
 0x629   : > { %1847 = vrsqrt.f32 %v1082_v14 }
 0x636   : > { %v1848_v15 = vpop.eup %1847 }
 0x637   : > { %v1084_v17 = vmul.f32 %v1848_v15, %v1076_v1 }
 0x639   : > { %v1091_v19 = vmul.f32 %v1565_v16, %v1084_v17 }
 0x63b   : > { %v1098_v20 = vadd.f32 %v1566_v18, %v1091_v19 }
 0x63d   : > { %v1099_v21 = vpack.c.bf16 %v1098_v20, %v1098_v20 }
 0x63f   : > { %1665 = vmatmul.mubr.msk.bf16.vlgmr.msra.gmra.mxu0 %vm721_vm1, %v1099_v21 }
 0x6ff   : > { %v1160_v25 = vpop.f32.mrf.mxu0 }
 0x700   : > { %v1161_v26 = vadd.f32 %v1567_v24, %v1160_v25 }
 0x701   : > { %v1666_v27 = vpop.f32.mrf.mxu0 }
 0x702   : > { %v1166_v28 = vmax.f32 %v1161_v26, 0.0 }
 0x703   : > { %v1163_v29 = vpop.f32.mrf.mxu0 }
 0x704   : > { %v1167_v30 = vpack.c.bf16 %v1166_v28, %v1166_v28 }
 0x705   : > { %v1667_v31 = vpop.f32.mrf.mxu0 }
 0x706   : > { %1685 = vmatmul.mubr.bf16.vlgmr.msra.gmra.mxu1 %v1167_v30 }
 0x7c6   : > { %v1273_v33 = vpop.f32.mrf.mxu1 }
 0x7c7   : > { %v1274_v0 = vadd.f32 %v1571_v32, %v1273_v33 }
 0x7c8   : > { %v1686_v34 = vpop.f32.mrf.mxu1 }
 0x7c9   : > { %v1279_v35 = vadd.f32 %v1274_v0, %v1098_v20 }
 0x7ca   : > { %v1276_v36 = vpop.f32.mrf.mxu1 }
 0x7cb   : > { %v1282_v37 = vsel %vm721_vm1, %v1279_v35, 0.0 }
 0x7cc   : > { %1283 = vadd.xlane.f32.xlu0 %v1282_v37  ;;  %v1687_v38 = vpop.f32.mrf.mxu1 }
 0x855   : > { %v1284_v39 = vpop.xlane.xlu0 %1283 }
 0x856   : > { %v1285_v40 = vmul.f32 0.03125, %v1284_v39 }
 0x858   : > { %v1286_v41 = vsub.f32 %v1279_v35, %v1285_v40 }
 0x85a   : > { %v1287_v42 = vmul.f32 %v1286_v41, %v1286_v41 }
 0x85c   : > { %v1288_v43 = vsel %vm721_vm1, %v1287_v42, 0.0 }
 0x85d   : > { %1289 = vadd.xlane.f32.xlu1 %v1288_v43 }
 0x85e   : > { %2098 = shalt.err (!%p2095_p10)
}
 0x85f   : > { %s2099_s3 = scalar_lea.hbm %s1341_s20, 128  ;;  %s2103_s5 = scalar_lea.hbm %s2668_s18, 256 }
 0x860   : > { %p2100_p12 = scmp.ne.s32.totalorder %s1341_s20, %s2099_s3  ;;  %p2104_p8 = scmp.lt.s32.totalorder %s1341_s20, %s2668_s18 }
 0x861   : > { %p2105_p11 = scmp.lt.s32.totalorder %s2103_s5, %s2099_s3 }
 0x862   : > { %p2101_p4 = pnand %p2100_p12, %p2718_p2 }
 0x863   : > { %p2106_p0 = por %p2105_p11, %p2104_p8 }
 0x864   : > { %p2102_p7 = pneg %p2101_p4 }
 0x866   : > { %p2107_p1 = pnand %p2106_p0, %p2102_p7 }
 0x868   : > { %2110 = shalt.err (!%p2107_p1)
}
 0x869   : > { %1725 = dma.vmem_to_hbm [thread:$0]  (%p2718_p2), %s1344_s27, 128, %s1341_s20, %s1317_s1   ;;  %v1580_v48 = vld [vmem:[%s2665_s15] ss:$0 sm:$0xff]  ;;  %v1581_v50 = vld [vmem:[#allocation16] ss:$0 sm:$0xff] }
 0x86a   : > { %s2719_s3 = sshll.u32 %s2526_s23, 3  ;;  %s2720_s21 = sshll.u32 %s2326_s0, 7 }
 0x86b   : > { %s683_s4 = scalar_lea.vmem [#allocation17], %s2719_s3  ;;  %s1328_s1 = scalar_lea.hbm %s2667_s17, %s2720_s21 }
 0x86c   : > { %s1330_s26 = sshll.u32 %s683_s4, 4  ;;  %s1312_s29 = scalar_lea.sflag [#allocation4], %s2526_s23  ;;  %s1331_s26 = int_to_ptr.vmem [resolvable:$true] %s1330_s26 }
 0x86d   : > { %s2111_s30 = scalar_lea.vmem %s1331_s26, 128  ;;  %s2209_s19 = smov [#allocation17]  }
 0x86e   : > { %p2112_p9 = scmp.ne.s32.totalorder %s1331_s26, %s2111_s30  ;;  %s2115_s5 = sshll.u32 %s2209_s19, 4  ;;  %s2116_s5 = int_to_ptr.vmem [resolvable:$false] %s2115_s5 }
 0x86f   : > { %s2117_s25 = scalar_lea.vmem %s2116_s5, 256  ;;  %p2118_p5 = scmp.lt.s32.totalorder %s1331_s26, %s2116_s5 }
 0x870   : > { %p2113_p3 = pnand %p2112_p9, %p2718_p2  ;;  %p2119_p6 = scmp.lt.s32.totalorder %s2117_s25, %s2111_s30 }
 0x872   : > { %p2114_p13 = pneg %p2113_p3  ;;  %p2120_p10 = por %p2119_p6, %p2118_p5 }
 0x874   : > { %p2121_p12 = pnand %p2120_p10, %p2114_p13 }
 0x8e6   : > { %v1290_v44 = vpop.xlane.xlu1 %1289 }
 0x8e7   : > { %v1291_v45 = vmul.f32 0.03125, %v1290_v44 }
 0x8e9   : > { %v1292_v46 = vadd.f32 1e-05, %v1291_v45 }
 0x8eb   : > { %1849 = vrsqrt.f32 %v1292_v46 }
 0x8f8   : > { %v1850_v47 = vpop.eup %1849 }
 0x8f9   : > { %v1294_v49 = vmul.f32 %v1850_v47, %v1286_v41 }
 0x8fb   : > { %v1301_v51 = vmul.f32 %v1580_v48, %v1294_v49 }
 0x8fd   : > { %v1308_v52 = vadd.f32 %v1581_v50, %v1301_v51 }
 0x8ff   : > { %1309 = vst.msk [vmem:[%s683_s4] sm:$0xff] %vm721_vm1, %v1308_v52 }
 0x900   : > { %2124 = shalt.err (!%p2121_p12)
}
 0x901   : > { %s2125_s0 = scalar_lea.hbm %s1328_s1, 128  ;;  %s2129_s3 = scalar_lea.hbm %s2667_s17, 256 }
 0x902   : > { %p2126_p4 = scmp.ne.s32.totalorder %s1328_s1, %s2125_s0  ;;  %p2130_p11 = scmp.lt.s32.totalorder %s1328_s1, %s2667_s17 }
 0x903   : > { %p2131_p0 = scmp.lt.s32.totalorder %s2129_s3, %s2125_s0 }
 0x904   : > { %p2127_p7 = pnand %p2126_p4, %p2718_p2 }
 0x905   : > { %p2132_p1 = por %p2131_p0, %p2130_p11 }
 0x906   : > { %p2128_p8 = pneg %p2127_p7 }
 0x908   : > { %p2133_p9 = pnand %p2132_p1, %p2128_p8 }
 0x90a   : > { %2136 = shalt.err (!%p2133_p9)
}
 0x90b   : > { %1724 = dma.vmem_to_hbm [thread:$0]  (%p2718_p2), %s1331_s26, 128, %s1328_s1, %s1312_s29  }
 0x90c PF: > { %s2721_s20 = sld [smem:[#allocation29_spill]] }
 0x90d   : > { %s2722_s27 = sld [smem:[#allocation27_spill]] }
 0x90e   : > { %s2723_s30 = sld [smem:[#allocation32_spill]] }
 0x912   : > { %p1781_p3 = scmp.ge.s32.totalorder %s2721_s20, 2 }
 0x913   : > { %s1355_s19 = sand.u32 1, %s2722_s27  }
 0x914   : > { %p2724_p13 = scmp.ne.s32.totalorder %s2723_s30, 0  ;;  %s1356_s5 = scalar_lea.sflag [#allocation4], %s1355_s19 }
 0x916   : > { %p1757_p5 = pnand %p1781_p3, %p2724_p13 }
 0x918   : > { %p1758_p6 = pneg %p1757_p5 }
 0x91a   : > { %2174 = dma.done.wait (%p1758_p6), %s1356_s5, 128  }
 0x91b   : > { %2176 = vsyncadd (%p1758_p6), %s1356_s5, 4294967168  ;;  %s1365_s25 = scalar_lea.sflag [#allocation19], %s1355_s19 }
 0x91c   : > { %2178 = dma.done.wait (%p1758_p6), %s1365_s25, 128  }
 0x91d   : > { %2180 = vsyncadd (%p1758_p6), %s1365_s25, 4294967168  ;;  %s2725_s30 = sld [smem:[#allocation30_spill]]  ;;  %s2728_s27 = smov %s2187_s28 }
 0x91e   : > { %s2726_s0 = sld [smem:[#allocation28_spill]] }
 0x91f   : > { %s2727_s29 = sld [smem:[#allocation31_spill]] }
 0x923   : > { %p37_p2 = scmp.ge.s32.totalorder %s2725_s30, 4  }
 0x924   : > { %s2729_s28 = smov %s2726_s0 }
 0x925   :  { %39 = sbr.rel (!%p37_p2) target bundleno = 17 (0x11), region = 177 }
 0x92a   :  { %1370 = vsyncpa [#allocation3], 1 }
 0x92b   :  { %1372 = vsyncpa [#allocation3 + $0x1], 1 }
 0x92c   :  { %1373 = vsyncpa [#allocation6], 1 }
 0x92d   :  { %1374 = vsyncpa [#allocation9], 1 }
 0x92e   :  { %1375 = vsyncpa [#allocation12], 1 }
 0x92f   :  { %1376 = vsyncpa [#allocation15], 1 }
 0x930   :  { %1377 = vsyncpa [#allocation4], 1 }
 0x931   :  { %1379 = vsyncpa [#allocation4 + $0x1], 1 }
 0x932   :  { %1380 = vsyncpa [#allocation19], 1 }
 0x933   :  { %1382 = vsyncpa [#allocation19 + $0x1], 1 }

</bundles_post_ra>
